<compile_context>
chip_gen: v7x
topology: tpu7x:2x2x1
jax: 0.10.0
libtpu: 0.0.40
codegen_flags: <defaults>
</compile_context>

<pallas_src>
import numpy as np
import jax
import jax.numpy as jnp
from jax.experimental import pallas as pl
from jax.experimental.pallas import tpu as pltpu

# ----------------------------- configuration -------------------------------
BINS = (1, 2, 3, 4, 8, 16, 32, 64, 128, 256, 384)   # Distance.bins
NUM_BINS = len(BINS)            # 11
NUM_EMBED = NUM_BINS + 1        # 12  (nn.Embedding(len(bins)+1, dim))
DISTANCE_DIM = 20               # distance_dim default


# ----------------------------- Pallas kernel --------------------------------

def distance_kernel(lengths_ref, bins_ref, table_ref, out_ref):
    """Fused stoi (bucketize) + embedding lookup for the Distance module.

    lengths_ref: (N, 1)  int32  span-distance values
    bins_ref:    (1, 11) int32  bin edges
    table_ref:   (12, 20) f32   embedding table
    out_ref:     (N, 20)  f32   distance embeddings
    """
    lengths = lengths_ref[...]                         # (N, 1)
    bins = bins_ref[...]                               # (1, NB)

    # stoi: which bin a number falls into == count of bins it strictly exceeds.
    gt = (lengths > bins).astype(jnp.int32)            # (N, NB)  VPU compare
    idx = jnp.sum(gt, axis=-1, keepdims=True)          # (N, 1)   XLU reduce

    # Embedding gather as a lane-dense one-hot matmul on the MXU
    # (avoids an in-kernel dynamic gather).
    cols = jax.lax.broadcasted_iota(jnp.int32, (1, NUM_EMBED), 1)   # (1, 12)
    one_hot = (idx == cols).astype(jnp.float32)                     # (N, 12)
    emb = jnp.dot(one_hot, table_ref[...],
                  preferred_element_type=jnp.float32)               # (N, 20)

    # TODO(synk): nn.Dropout(0.3) is identity in eval mode; training-mode RNG
    # dropout is not modeled.
    out_ref[...] = emb


# ------------------------------- wrapper ------------------------------------

def distance_forward(lengths, emb_table):
    """Equivalent of Distance.forward(lengths) -> (N, DISTANCE_DIM)."""
    lengths = jnp.asarray(lengths, jnp.int32)
    n = lengths.shape[0]
    bins_2d = jnp.asarray(BINS, jnp.int32).reshape(1, NUM_BINS)
    return pl.pallas_call(
        distance_kernel,
        out_shape=jax.ShapeDtypeStruct((n, DISTANCE_DIM), jnp.float32),
        in_specs=[pl.BlockSpec(memory_space=pltpu.MemorySpace.VMEM)] * 3,
        out_specs=pl.BlockSpec(memory_space=pltpu.MemorySpace.VMEM),
    )(lengths.reshape(n, 1), bins_2d, emb_table)


# --------------------------- pure reference ---------------------------------

def distance_ref(lengths, emb_table):
    lengths = np.asarray(lengths, np.int64)
    bins = np.asarray(BINS, np.int64)
    idx = np.sum(lengths[:, None] > bins[None, :], axis=1)   # stoi
    return np.asarray(emb_table)[idx]                        # embedding lookup


# ----------------------------------- main ------------------------------------

if __name__ == "__main__":
    key = jax.random.PRNGKey(0)
    k_emb, k_len = jax.random.split(key)

    # nn.Embedding default init ~ N(0, 1)
    emb_table = jax.random.normal(k_emb, (NUM_EMBED, DISTANCE_DIM), jnp.float32)

    # deterministic span-distance lengths; range covers every bin (incl. > 384)
    n = 16
    lengths = jax.random.randint(k_len, (n,), 0, 512, jnp.int32)

    out = distance_forward(lengths, emb_table)
    out = jax.block_until_ready(out)
    assert out.shape == (n, DISTANCE_DIM), out.shape

    ref = distance_ref(np.asarray(lengths), emb_table)
    np.testing.assert_allclose(np.asarray(out), ref, rtol=1e-6, atol=1e-6)

    print("KERNEL_OK")
</pallas_src>

<mosaic_0001>
module attributes {stable_mosaic.version = 11 : i64} {
  func.func @distance_kernel(%arg0: memref<16x1xi32, #tpu.memory_space<vmem>>, %arg1: memref<1x11xi32, #tpu.memory_space<vmem>>, %arg2: memref<12x20xf32, #tpu.memory_space<vmem>>, %arg3: memref<16x20xf32, #tpu.memory_space<vmem>>) attributes {dimension_semantics = [], scalar_prefetch = 0 : i64, scratch_operands = 0 : i64, tpu.core_type = #tpu.core_type<tc>} {
    %c0 = arith.constant 0 : index
    %c0_0 = arith.constant 0 : index
    %0 = vector.load %arg0[%c0, %c0_0] : memref<16x1xi32, #tpu.memory_space<vmem>>, vector<16x1xi32>
    %c0_1 = arith.constant 0 : index
    %c0_2 = arith.constant 0 : index
    %1 = vector.load %arg1[%c0_1, %c0_2] : memref<1x11xi32, #tpu.memory_space<vmem>>, vector<1x11xi32>
    %2 = vector.broadcast %0 : vector<16x1xi32> to vector<16x11xi32>
    %3 = vector.broadcast %1 : vector<1x11xi32> to vector<16x11xi32>
    %4 = arith.cmpi sgt, %2, %3 : vector<16x11xi32>
    %5 = arith.extui %4 : vector<16x11xi1> to vector<16x11xi32>
    %cst = arith.constant dense<0> : vector<16xi32>
    %6 = vector.multi_reduction <add>, %5, %cst [1] : vector<16x11xi32> to vector<16xi32>
    %7 = vector.shape_cast %6 : vector<16xi32> to vector<16x1xi32>
    %8 = tpu.iota {dimensions = array<i32: 1>} : vector<1x12xi32>
    %9 = vector.broadcast %7 : vector<16x1xi32> to vector<16x12xi32>
    %10 = vector.broadcast %8 : vector<1x12xi32> to vector<16x12xi32>
    %11 = arith.cmpi eq, %9, %10 : vector<16x12xi32>
    %12 = arith.extui %11 : vector<16x12xi1> to vector<16x12xi32>
    %13 = arith.sitofp %12 : vector<16x12xi32> to vector<16x12xf32>
    %c0_3 = arith.constant 0 : index
    %c0_4 = arith.constant 0 : index
    %14 = vector.load %arg2[%c0_3, %c0_4] : memref<12x20xf32, #tpu.memory_space<vmem>>, vector<12x20xf32>
    %cst_5 = arith.constant dense<0.000000e+00> : vector<16x20xf32>
    %15 = tpu.matmul %13, %14, %cst_5 {dimension_numbers = #tpu.dot_dimension_numbers<[1], [0], [0], [1], [0, 0, 1, 1], [], []>} : vector<16x12xf32>, vector<12x20xf32>, vector<16x20xf32> -> vector<16x20xf32>
    %c0_6 = arith.constant 0 : index
    %c0_7 = arith.constant 0 : index
    %16 = vector.load %arg3[%c0_6, %c0_7] : memref<16x20xf32, #tpu.memory_space<vmem>>, vector<16x20xf32>
    tpu.vector_store %arg3[%c0_6, %c0_7], %15 {strides = array<i32>} : memref<16x20xf32, #tpu.memory_space<vmem>>, vector<16x20xf32>,
    return
  }
}

</mosaic_0001>

<bundles_post_ra>
// kernel: tpu_custom_call.1
= control target key start
LH: loop header
LB: loop body
LE: loop exit
PB: predicated region body
PF: predicated region fallthrough
CT: control target
= control target key end

     0   :  { %v228_v1 = vmov 0   ;;  %s281_s0 = inlined_call_operand.vmem [shape: s32[16,1], index: 0, kind: input, shape index: {}]   ;;  %s282_s1 = inlined_call_operand.vmem [shape: s32[1,11], index: 1, kind: input, shape index: {}]   ;;  %s283_s2 = inlined_call_operand.vmem [shape: f32[12,20], index: 2, kind: input, shape index: {}]   ;;  %s284_s3 = inlined_call_operand.hbm [shape: f32[16,20], index: 3, kind: output, shape index: {}]  }
   0x1   :  { %v15_v0 = vld [vmem:[%s281_s0] sm:$0xff]  ;;  %203 = vset.pattern.permute.xlu0 %v228_v1 }
   0x2   :  { %8 = vsyncpa [#allocation3], 0  ;;  %19 = vperm.xlu0 %203, %v15_v0   ;;  %v16_v2 = vld [vmem:[%s281_s0 + $0x8] sm:$0xff]  ;;  %v174_v3 = vld [vmem:[%s282_s1] ss:$0 sm:$0xff]  ;;  %vm32_vm0 = vcmask 89088   ;;  %v59_v21 = vlaneseq }
   0x3   :  { %v67_v18 = vld [vmem:[%s283_s2] sm:$0xff]  ;;  %v68_v19 = vld [vmem:[%s283_s2 + $0x8] sm:$0xf]  ;;  %vm76_vm3 = vcmask 1043456   ;;  %vm229_vm4 = vmmov 1   ;;  %vm69_vm6 = vcmask 97280  }
   0x4   :  { %v191_v20 = vpack.c.bf16 %v68_v19, %v67_v18  ;;  %vm192_vm5 = vmpackc.low %vm76_vm3, %vm229_vm4  ;;  %v60_v27 = vand.u32 127, %v59_v21  ;;  %v230_v32 = vmov 0.0   ;;  %s231_s2 = smov [#allocation2]   ;;  %vm155_vm9 = vcmask 162816  }
   0x5   :  { %s163_s20 = sshll.u32 %s231_s2, 4  ;;  %s164_s20 = int_to_ptr.vmem [resolvable:$true] %s163_s20 }
   0x6   :  { %22 = vperm.xlu0 %203, %v16_v2   ;;  %193 = vmatprep.subr.msk.bf16.mxu0 %vm192_vm5, %v191_v20  ;;  %s204_s21 = scalar_lea.vmem %s164_s20, 256  ;;  %p209_p1 = scmp.lt.s32.totalorder %s164_s20, %s164_s20 }
   0x7   :  { %196 = vmatpush3.bf16.msk.msra.mxu0 %vm192_vm5, %v191_v20  ;;  %p205_p0 = scmp.ne.s32.totalorder %s164_s20, %s204_s21  ;;  %p210_p2 = scmp.lt.s32.totalorder %s204_s21, %s204_s21 }
   0x9   :  { %p211_p3 = por %p210_p2, %p209_p1 }
   0xb   :  { %p212_p4 = pnand %p211_p3, %p205_p0 }
  0x81   :  { %v20_v4 = vpop.permute.xlu0 %19 }
  0x82   :  { %vm28_vm1 = vcmp.gt.s32.totalorder %v20_v4, %v174_v3 }
  0x83   :  { %v30_v5 = vsel %vm28_vm1, 1, %v228_v1 }
  0x84   :  { %v33_v6 = vsel %vm32_vm0, %v30_v5, 0 }
  0x85   :  { %v23_v7 = vpop.permute.xlu0 %22  ;;  %v35_v8 = vshrl.u32 %v33_v6, 16  ;;  %v34_v9 = vand.u32 65535, %v33_v6 }
  0x86   :  { %vm29_vm2 = vcmp.gt.s32.totalorder %v23_v7, %v174_v3 }
  0x87   :  { %v31_v10 = vsel %vm29_vm2, 1, %v228_v1  ;;  %v37_v11 = vcvt.s32.f32 %v35_v8  ;;  %v36_v12 = vcvt.s32.f32 %v34_v9 }
  0x88   :  { %v46_v13 = vsel %vm32_vm0, %v31_v10, 0 }
  0x89   :  { %40 = vadd.xlane.f32.xlu1 %v37_v11  ;;  %38 = vadd.xlane.f32.xlu0 %v36_v12  ;;  %v48_v14 = vshrl.u32 %v46_v13, 16  ;;  %v47_v16 = vand.u32 65535, %v46_v13 }
  0x8b   :  { %v50_v15 = vcvt.s32.f32 %v48_v14  ;;  %v49_v17 = vcvt.s32.f32 %v47_v16 }
  0x8d   :  { %53 = vadd.xlane.f32.xlu1 %v50_v15 }
  0x91   :  { %51 = vadd.xlane.f32.xlu1 %v49_v17 }
 0x116   :  { %v41_v22 = vpop.xlane.xlu1 %40  ;;  %v39_v23 = vpop.xlane.xlu0 %38 }
 0x117   :  { %v43_v24 = vcvt.f32.s32 %v41_v22  ;;  %v42_v26 = vcvt.f32.s32 %v39_v23 }
 0x119   :  { %v44_v25 = vshll.u32 %v43_v24, 16 }
 0x11a   :  { %v54_v28 = vpop.xlane.xlu1 %53 }
 0x11b   :  { %v45_v29 = vadd.s32 %v44_v25, %v42_v26  ;;  %v56_v30 = vcvt.f32.s32 %v54_v28 }
 0x11d   :  { %vm61_vm7 = vcmp.eq.s32.totalorder %v45_v29, %v60_v27  ;;  %v57_v34 = vshll.u32 %v56_v30, 16 }
 0x11e   :  { %v52_v31 = vpop.xlane.xlu1 %51  ;;  %v175_v33 = vsel %vm61_vm7, 1.0, %v230_v32 }
 0x11f   :  { %v55_v35 = vcvt.f32.s32 %v52_v31  ;;  %188 = vmatprep.mubr.msk.f32.mxu0 %vm69_vm6, %v175_v33 }
 0x121   :  { %v58_v36 = vadd.s32 %v57_v34, %v55_v35 }
 0x123   :  { %vm62_vm8 = vcmp.eq.s32.totalorder %v58_v36, %v60_v27 }
 0x124   :  { %v176_v37 = vsel %vm62_vm8, 1.0, %v230_v32 }
 0x125   :  { %189 = vmatmul.mubr.msk.f32.vlgmr.msra.gmra.mrb[0].mxu0 %vm69_vm6, %v176_v37 }
 0x1f8   :  { %v190_v38 = vpop.f32.mrb[0].mxu0 }
 0x1f9   :  { %157 = vst.msk [vmem:[#allocation2 + $0x8] sm:$0xff] %vm155_vm9, %v190_v38  ;;  %v146_v39 = vpop.f32.mrb[1].mxu0 }
 0x1fa   :  { %156 = vst.msk [vmem:[#allocation2] sm:$0xff] %vm155_vm9, %v146_v39 }
 0x1fb   :  { %215 = shalt.err (!%p212_p4)
}
 0x1fc   :  { %s216_s24 = scalar_lea.hbm %s284_s3, 256 }
 0x1fd   :  { %p217_p5 = scmp.ne.s32.totalorder %s284_s3, %s216_s24  ;;  %p220_p6 = scmp.lt.u32.totalorder %s216_s24, %s284_s3 }
 0x1ff   :  { %p222_p7 = pnand %p220_p6, %p217_p5 }
 0x201   :  { %225 = shalt.err (!%p222_p7)
}
 0x202   :  { %s232_s29 = smov 128   ;;  %s233_s30 = smov 8  }
 0x203   :  { %169 = dma.vmem_to_hbm [thread:$0]  %s164_s20, 256, %s284_s3, [#allocation3], %s232_s29, %s232_s29, %s233_s30  }
 0x204   :  { %226 = dma.done.wait [#allocation3], 256  }
 0x205   :  { %227 = vsyncadd [#allocation3], 4294967040 }
 0x206   :  { %173 = vsyncpa [#allocation3], 1 }

</bundles_post_ra>
